<compile_context>
chip_gen: v6e
topology: v6e:2x2x1
jax: 0.10.0
libtpu: 0.0.40
codegen_flags: <defaults>
</compile_context>

<pallas_src>
import functools

import jax
import jax.numpy as jnp
from jax import lax
from jax.experimental import pallas as pl
from jax.experimental.pallas import tpu as pltpu


def _vae_loss_kernel(n_total,
                     xpred_ref, labels_ref, zmean_ref, zlogvar_ref,
                     nll_ref, kl_ref, kl2_ref):
    # Grid: (shard, row-tile step).  Row-tile axis is the reduction axis.
    j = pl.program_id(1)
    blk = pl.program_id(0) * pl.num_programs(1) + j     # global row-block index
    tm, c = xpred_ref.shape
    d = zmean_ref.shape[-1]

    @pl.when(j == 0)
    def _init():
        nll_ref[...] = jnp.zeros_like(nll_ref)
        kl_ref[...] = jnp.zeros_like(kl_ref)
        kl2_ref[...] = jnp.zeros_like(kl2_ref)

    # Row-validity mask for padded / clamped-duplicate tiles (logical rows).
    row = blk * tm + lax.broadcasted_iota(jnp.int32, (tm, 1), 0)
    valid = row < n_total                                # (tm, 1) bool

    # --- NLL: gather x_pred[n, labels[n]] via lane-iota one-hot + row sum ---
    # Select in the native dtype (exactly one survivor per row -> exact);
    # only the (tm, 1) per-row result is upcast to f32 for accumulation.
    labels = labels_ref[...]                             # (tm, 1) int32
    col = lax.broadcasted_iota(jnp.int32, (tm, c), 1)
    onehot = (col == labels) & valid                     # (tm, C) bool
    sel = jnp.where(onehot, xpred_ref[...], jnp.zeros((), xpred_ref.dtype))
    nll_rows = (-jnp.sum(sel, axis=1, keepdims=True)).astype(jnp.float32)

    # --- KL per row: mean over D of exp(lv) + m^2 - 1 - lv (f32 math) ---
    # Zero padded rows *before* exp so garbage never overflows.
    zm = jnp.where(valid, zmean_ref[...].astype(jnp.float32), 0.0)
    lv = jnp.where(valid, zlogvar_ref[...].astype(jnp.float32), 0.0)
    kl_rows = jnp.sum(jnp.exp(lv) + zm * zm - 1.0 - lv,
                      axis=1, keepdims=True) * jnp.float32(1.0 / d)   # (tm, 1)

    # Per-step scalar reduce (XLU slack hides it under DMA), accumulate into
    # the resident per-shard output blocks (same block index across j).
    nll_ref[...] += jnp.sum(nll_rows)
    kl_ref[...] += jnp.sum(kl_rows)
    kl2_ref[...] += jnp.sum(kl_rows * kl_rows)


def _vmem_limit_bytes():
    """Generation-aware scoped-VMEM request (~3/4 of physical, with headroom)."""
    mib = 1024 * 1024
    try:
        cap = int(pltpu.get_tpu_info().vmem_capacity_bytes)
    except Exception:
        cap = 64 * mib                      # conservative fallback (v7x-sized)
    limit = min((3 * cap) // 4, cap - 16 * mib)
    return max(32 * mib, limit)             # 96 MiB on v5e/v6e, 48 MiB on v7x


def _choose_row_tile(n, c, d, xp_bytes, z_bytes, vmem_limit):
    """Row tile: ~8 MiB of real HBM traffic per step, capped by VMEM budget."""
    # Actual HBM bytes streamed per row (native dtypes + 4 B label).
    hbm_row = c * xp_bytes + 4 + 2 * d * z_bytes
    tm = (8 * 1024 * 1024) // max(1, hbm_row)
    # VMEM bytes per row: double-buffered input blocks (labels pad to 128
    # lanes -> 512 B/row) + in-kernel (tm, C) iota/mask/select and (tm, D)
    # f32 temporaries (budgeted generously).
    vmem_row = 2 * (c * xp_bytes + 512 + 2 * d * z_bytes) + 2 * 4 * c + 3 * 4 * d
    tm = min(tm, int(0.6 * vmem_limit) // max(1, vmem_row), 8192)
    if tm >= n:
        return n                            # single full-extent block
    return max(8, (tm // 8) * 8)


def vae_loss(x_pred, x, z_mean, z_log_var):
    n, c = x_pred.shape
    d = z_mean.shape[-1]
    labels = x.astype(jnp.int32).reshape(n, 1)

    vmem_limit = _vmem_limit_bytes()
    tm = _choose_row_tile(n, c, d, x_pred.dtype.itemsize,
                          z_mean.dtype.itemsize, vmem_limit)
    total_blocks = pl.cdiv(n, tm)

    # Split the batch across two shards (v7x: one per TensorCore).  On 1-TC
    # parts the shards just run sequentially; only shard when it does not
    # introduce a wasted (duplicate) tile, or when that waste is negligible.
    num_shards = 1
    if total_blocks >= 2 and (total_blocks % 2 == 0 or total_blocks >= 16):
        num_shards = 2
    steps = pl.cdiv(total_blocks, num_shards)
    last_blk = total_blocks - 1

    def row_block(s, j):
        # Clamp so over-coverage steps re-fetch the last real block (fully
        # masked in-kernel) instead of issuing an out-of-bounds DMA.
        return (jnp.minimum(s * steps + j, last_blk), 0)

    # Per-shard partial sums.  3-D (shard, 1, 128) so the block's last two
    # dims equal the full extents (lane-dense, layout-legal); every lane of a
    # row holds the same scalar.
    part = jax.ShapeDtypeStruct((num_shards, 1, 128), jnp.float32)
    out_spec = pl.BlockSpec((1, 1, 128), lambda s, j: (s, 0, 0))

    kernel = functools.partial(_vae_loss_kernel, n)

    cost = pl.CostEstimate(
        flops=int(n * (3 * c + 7 * d)),
        transcendentals=int(n * d),
        bytes_accessed=int(n * c * x_pred.dtype.itemsize
                           + n * d * (z_mean.dtype.itemsize
                                      + z_log_var.dtype.itemsize)
                           + n * 4 + 3 * num_shards * 128 * 4),
    )

    nll_sum, kl_sum, kl2_sum = pl.pallas_call(
        kernel,
        out_shape=(part, part, part),
        grid_spec=pltpu.PrefetchScalarGridSpec(
            num_scalar_prefetch=0,
            grid=(num_shards, steps),
            in_specs=[
                pl.BlockSpec((tm, c), row_block),   # x_pred (native dtype)
                pl.BlockSpec((tm, 1), row_block),   # labels (int32)
                pl.BlockSpec((tm, d), row_block),   # z_mean
                pl.BlockSpec((tm, d), row_block),   # z_log_var
            ],
            out_specs=(out_spec, out_spec, out_spec),
        ),
        compiler_params=pltpu.CompilerParams(
            dimension_semantics=("parallel", "arbitrary"),
            vmem_limit_bytes=vmem_limit,
        ),
        cost_estimate=cost,
    )(x_pred, labels, z_mean, z_log_var)

    # Tiny final combine (3 adds + divides) over the per-shard partial sums.
    inv_n = jnp.float32(1.0 / n)
    r = jnp.sum(nll_sum[:, 0, 0]) * inv_n          # r_loss (= r_loss.mean())
    klm = jnp.sum(kl_sum[:, 0, 0]) * inv_n         # kl_loss.mean()
    klsq = jnp.sum(kl2_sum[:, 0, 0]) * inv_n       # (kl_loss**2).mean()
    ratio = (r * r + klsq) / (r + klm)             # matches (r^2+kl^2).mean()/(r+kl).mean()
    return r, klm, ratio


def vae_loss_ref(x_pred, x, z_mean, z_log_var):
    # Pure-JAX reference mirroring the PyTorch semantics.
    xp = x_pred.astype(jnp.float32)
    zm = z_mean.astype(jnp.float32)
    lv = z_log_var.astype(jnp.float32)
    nll = -jnp.take_along_axis(xp, x[:, None].astype(jnp.int32), axis=1)[:, 0]
    r_loss = jnp.mean(nll)
    kl = jnp.mean(jnp.exp(lv) + zm ** 2 - 1.0 - lv, axis=1)
    mean_loss = jnp.mean(r_loss + kl)
    return r_loss, jnp.mean(kl), jnp.mean(r_loss * r_loss + kl * kl) / mean_loss


if __name__ == "__main__":
    key = jax.random.PRNGKey(0)
    k1, k2, k3, k4 = jax.random.split(key, 4)

    # --- Small f32 case (batch of names, vocab C, latent D) ---
    N, C, D = 8, 128, 32
    logits = jax.random.normal(k1, (N, C), dtype=jnp.float32)
    x_pred = jax.nn.log_softmax(logits, axis=-1)     # log-probs for nll_loss
    x = jax.random.randint(k2, (N,), 0, C, dtype=jnp.int32)
    z_mean = jax.random.normal(k3, (N, D), dtype=jnp.float32)
    z_log_var = 0.1 * jax.random.normal(k4, (N, D), dtype=jnp.float32)

    out = jax.block_until_ready(vae_loss(x_pred, x, z_mean, z_log_var))
    ref = vae_loss_ref(x_pred, x, z_mean, z_log_var)
    for a, b in zip(out, ref):
        assert jnp.allclose(a, b, rtol=1e-5, atol=1e-5), (a, b)

    # --- Larger bf16 case: multi-tile streaming, ragged masked last tile,
    #     and the two-shard "parallel" batch split. ---
    N2, C2, D2 = 30000, 96, 48
    kk = jax.random.split(jax.random.PRNGKey(1), 4)
    logits2 = jax.random.normal(kk[0], (N2, C2), dtype=jnp.float32)
    x_pred2 = jax.nn.log_softmax(logits2, axis=-1).astype(jnp.bfloat16)
    x2 = jax.random.randint(kk[1], (N2,), 0, C2, dtype=jnp.int32)
    z_mean2 = jax.random.normal(kk[2], (N2, D2)).astype(jnp.bfloat16)
    z_log_var2 = (0.1 * jax.random.normal(kk[3], (N2, D2))).astype(jnp.bfloat16)

    out2 = jax.block_until_ready(vae_loss(x_pred2, x2, z_mean2, z_log_var2))
    ref2 = vae_loss_ref(x_pred2, x2, z_mean2, z_log_var2)
    for a, b in zip(out2, ref2):
        assert jnp.allclose(a, b, rtol=1e-4, atol=1e-4), (a, b)

    print("KERNEL_OK")
</pallas_src>

<mosaic_0001>
module attributes {stable_mosaic.version = 11 : i64} {
  func.func @_vae_loss_kernel(%arg0: i32, %arg1: i32, %arg2: memref<8x128xf32, #tpu.memory_space<vmem>>, %arg3: memref<8x1xi32, #tpu.memory_space<vmem>>, %arg4: memref<8x32xf32, #tpu.memory_space<vmem>>, %arg5: memref<8x32xf32, #tpu.memory_space<vmem>>, %arg6: memref<1x1x128xf32, #tpu.memory_space<vmem>>, %arg7: memref<1x1x128xf32, #tpu.memory_space<vmem>>, %arg8: memref<1x1x128xf32, #tpu.memory_space<vmem>>) attributes {dimension_semantics = [#tpu.dimension_semantics<parallel>, #tpu.dimension_semantics<arbitrary>], iteration_bounds = array<i64: 1, 1>, scalar_prefetch = 0 : i64, scratch_operands = 0 : i64, tpu.core_type = #tpu.core_type<tc>, window_params = [{transform_indices = @transform_0, window_bounds = array<i64: 8, 128>}, {transform_indices = @transform_1, window_bounds = array<i64: 8, 1>}, {transform_indices = @transform_2, window_bounds = array<i64: 8, 32>}, {transform_indices = @transform_3, window_bounds = array<i64: 8, 32>}, {transform_indices = @transform_4, window_bounds = array<i64: 1, 1, 128>}, {transform_indices = @transform_5, window_bounds = array<i64: 1, 1, 128>}, {transform_indices = @transform_6, window_bounds = array<i64: 1, 1, 128>}]} {
    %c1_i32 = arith.constant 1 : i32
    %0 = arith.muli %arg0, %c1_i32 : i32
    %1 = arith.addi %0, %arg1 : i32
    %c0_i32 = arith.constant 0 : i32
    %2 = arith.cmpi eq, %arg1, %c0_i32 : i32
    %3 = arith.extui %2 : i1 to i32
    %c0_i32_0 = arith.constant 0 : i32
    %4 = arith.cmpi ne, %3, %c0_i32_0 : i32
    scf.if %4 {
      %cst_37 = arith.constant 0.000000e+00 : f32
      %69 = vector.broadcast %cst_37 : f32 to vector<1x1x128xf32>
      %c0_38 = arith.constant 0 : index
      %c0_39 = arith.constant 0 : index
      %c0_40 = arith.constant 0 : index
      %70 = vector.load %arg6[%c0_38, %c0_39, %c0_40] : memref<1x1x128xf32, #tpu.memory_space<vmem>>, vector<1x1x128xf32>
      tpu.vector_store %arg6[%c0_38, %c0_39, %c0_40], %69 {strides = array<i32>} : memref<1x1x128xf32, #tpu.memory_space<vmem>>, vector<1x1x128xf32>,
      %cst_41 = arith.constant 0.000000e+00 : f32
      %71 = vector.broadcast %cst_41 : f32 to vector<1x1x128xf32>
      %c0_42 = arith.constant 0 : index
      %c0_43 = arith.constant 0 : index
      %c0_44 = arith.constant 0 : index
      %72 = vector.load %arg7[%c0_42, %c0_43, %c0_44] : memref<1x1x128xf32, #tpu.memory_space<vmem>>, vector<1x1x128xf32>
      tpu.vector_store %arg7[%c0_42, %c0_43, %c0_44], %71 {strides = array<i32>} : memref<1x1x128xf32, #tpu.memory_space<vmem>>, vector<1x1x128xf32>,
      %cst_45 = arith.constant 0.000000e+00 : f32
      %73 = vector.broadcast %cst_45 : f32 to vector<1x1x128xf32>
      %c0_46 = arith.constant 0 : index
      %c0_47 = arith.constant 0 : index
      %c0_48 = arith.constant 0 : index
      %74 = vector.load %arg8[%c0_46, %c0_47, %c0_48] : memref<1x1x128xf32, #tpu.memory_space<vmem>>, vector<1x1x128xf32>
      tpu.vector_store %arg8[%c0_46, %c0_47, %c0_48], %73 {strides = array<i32>} : memref<1x1x128xf32, #tpu.memory_space<vmem>>, vector<1x1x128xf32>,
    } else {
    }
    %c8_i32 = arith.constant 8 : i32
    %5 = arith.muli %1, %c8_i32 : i32
    %6 = tpu.iota {dimensions = array<i32: 0>} : vector<8x1xi32>
    %7 = vector.broadcast %5 : i32 to vector<8x1xi32>
    %8 = arith.addi %7, %6 : vector<8x1xi32>
    %c8_i32_1 = arith.constant 8 : i32
    %9 = vector.broadcast %c8_i32_1 : i32 to vector<8x1xi32>
    %10 = arith.cmpi slt, %8, %9 : vector<8x1xi32>
    %c0 = arith.constant 0 : index
    %c0_2 = arith.constant 0 : index
    %11 = vector.load %arg3[%c0, %c0_2] : memref<8x1xi32, #tpu.memory_space<vmem>>, vector<8x1xi32>
    %12 = tpu.iota {dimensions = array<i32: 1>} : vector<8x128xi32>
    %13 = vector.broadcast %11 : vector<8x1xi32> to vector<8x128xi32>
    %14 = arith.cmpi eq, %12, %13 : vector<8x128xi32>
    %15 = vector.broadcast %10 : vector<8x1xi1> to vector<8x128xi1>
    %16 = arith.andi %14, %15 : vector<8x128xi1>
    %c0_3 = arith.constant 0 : index
    %c0_4 = arith.constant 0 : index
    %17 = vector.load %arg2[%c0_3, %c0_4] : memref<8x128xf32, #tpu.memory_space<vmem>>, vector<8x128xf32>
    %cst = arith.constant 0.000000e+00 : f32
    %18 = vector.broadcast %cst : f32 to vector<8x128xf32>
    %19 = arith.select %16, %17, %18 : vector<8x128xi1>, vector<8x128xf32>
    %cst_5 = arith.constant dense<0.000000e+00> : vector<8xf32>
    %20 = vector.multi_reduction <add>, %19, %cst_5 [1] : vector<8x128xf32> to vector<8xf32>
    %21 = vector.shape_cast %20 : vector<8xf32> to vector<8x1xf32>
    %cst_6 = arith.constant 0.000000e+00 : f32
    %22 = vector.broadcast %cst_6 : f32 to vector<8x1xf32>
    %23 = arith.subf %22, %21 : vector<8x1xf32>
    %c0_7 = arith.constant 0 : index
    %c0_8 = arith.constant 0 : index
    %24 = vector.load %arg4[%c0_7, %c0_8] : memref<8x32xf32, #tpu.memory_space<vmem>>, vector<8x32xf32>
    %cst_9 = arith.constant 0.000000e+00 : f32
    %25 = vector.shape_cast %10 : vector<8x1xi1> to vector<8x1xi1>
    %26 = vector.broadcast %25 : vector<8x1xi1> to vector<8x32xi1>
    %27 = vector.broadcast %cst_9 : f32 to vector<8x32xf32>
    %28 = arith.select %26, %24, %27 : vector<8x32xi1>, vector<8x32xf32>
    %c0_10 = arith.constant 0 : index
    %c0_11 = arith.constant 0 : index
    %29 = vector.load %arg5[%c0_10, %c0_11] : memref<8x32xf32, #tpu.memory_space<vmem>>, vector<8x32xf32>
    %cst_12 = arith.constant 0.000000e+00 : f32
    %30 = vector.shape_cast %10 : vector<8x1xi1> to vector<8x1xi1>
    %31 = vector.broadcast %30 : vector<8x1xi1> to vector<8x32xi1>
    %32 = vector.broadcast %cst_12 : f32 to vector<8x32xf32>
    %33 = arith.select %31, %29, %32 : vector<8x32xi1>, vector<8x32xf32>
    %34 = math.exp %33 : vector<8x32xf32>
    %35 = arith.mulf %28, %28 : vector<8x32xf32>
    %36 = arith.addf %34, %35 : vector<8x32xf32>
    %cst_13 = arith.constant 1.000000e+00 : f32
    %37 = vector.broadcast %cst_13 : f32 to vector<8x32xf32>
    %38 = arith.subf %36, %37 : vector<8x32xf32>
    %39 = arith.subf %38, %33 : vector<8x32xf32>
    %cst_14 = arith.constant dense<0.000000e+00> : vector<8xf32>
    %40 = vector.multi_reduction <add>, %39, %cst_14 [1] : vector<8x32xf32> to vector<8xf32>
    %41 = vector.shape_cast %40 : vector<8xf32> to vector<8x1xf32>
    %cst_15 = arith.constant 3.125000e-02 : f32
    %42 = vector.broadcast %cst_15 : f32 to vector<8x1xf32>
    %43 = arith.mulf %41, %42 : vector<8x1xf32>
    %c0_16 = arith.constant 0 : index
    %c0_17 = arith.constant 0 : index
    %c0_18 = arith.constant 0 : index
    %44 = vector.load %arg6[%c0_16, %c0_17, %c0_18] : memref<1x1x128xf32, #tpu.memory_space<vmem>>, vector<1x1x128xf32>
    %45 = vector.shape_cast %23 : vector<8x1xf32> to vector<1x8x1xf32>
    %cst_19 = arith.constant dense<0.000000e+00> : vector<1xf32>
    %46 = vector.multi_reduction <add>, %45, %cst_19 [1, 2] : vector<1x8x1xf32> to vector<1xf32>
    %47 = vector.shape_cast %46 : vector<1xf32> to vector<1x1x1xf32>
    %48 = vector.extract %47[0, 0, 0] : f32 from vector<1x1x1xf32>
    %49 = vector.broadcast %48 : f32 to vector<1x1x128xf32>
    %50 = arith.addf %44, %49 : vector<1x1x128xf32>
    %c0_20 = arith.constant 0 : index
    %c0_21 = arith.constant 0 : index
    %c0_22 = arith.constant 0 : index
    %51 = vector.load %arg6[%c0_20, %c0_21, %c0_22] : memref<1x1x128xf32, #tpu.memory_space<vmem>>, vector<1x1x128xf32>
    tpu.vector_store %arg6[%c0_20, %c0_21, %c0_22], %50 {strides = array<i32>} : memref<1x1x128xf32, #tpu.memory_space<vmem>>, vector<1x1x128xf32>,
    %c0_23 = arith.constant 0 : index
    %c0_24 = arith.constant 0 : index
    %c0_25 = arith.constant 0 : index
    %52 = vector.load %arg7[%c0_23, %c0_24, %c0_25] : memref<1x1x128xf32, #tpu.memory_space<vmem>>, vector<1x1x128xf32>
    %53 = vector.shape_cast %43 : vector<8x1xf32> to vector<1x8x1xf32>
    %cst_26 = arith.constant dense<0.000000e+00> : vector<1xf32>
    %54 = vector.multi_reduction <add>, %53, %cst_26 [1, 2] : vector<1x8x1xf32> to vector<1xf32>
    %55 = vector.shape_cast %54 : vector<1xf32> to vector<1x1x1xf32>
    %56 = vector.extract %55[0, 0, 0] : f32 from vector<1x1x1xf32>
    %57 = vector.broadcast %56 : f32 to vector<1x1x128xf32>
    %58 = arith.addf %52, %57 : vector<1x1x128xf32>
    %c0_27 = arith.constant 0 : index
    %c0_28 = arith.constant 0 : index
    %c0_29 = arith.constant 0 : index
    %59 = vector.load %arg7[%c0_27, %c0_28, %c0_29] : memref<1x1x128xf32, #tpu.memory_space<vmem>>, vector<1x1x128xf32>
    tpu.vector_store %arg7[%c0_27, %c0_28, %c0_29], %58 {strides = array<i32>} : memref<1x1x128xf32, #tpu.memory_space<vmem>>, vector<1x1x128xf32>,
    %c0_30 = arith.constant 0 : index
    %c0_31 = arith.constant 0 : index
    %c0_32 = arith.constant 0 : index
    %60 = vector.load %arg8[%c0_30, %c0_31, %c0_32] : memref<1x1x128xf32, #tpu.memory_space<vmem>>, vector<1x1x128xf32>
    %61 = arith.mulf %43, %43 : vector<8x1xf32>
    %62 = vector.shape_cast %61 : vector<8x1xf32> to vector<1x8x1xf32>
    %cst_33 = arith.constant dense<0.000000e+00> : vector<1xf32>
    %63 = vector.multi_reduction <add>, %62, %cst_33 [1, 2] : vector<1x8x1xf32> to vector<1xf32>
    %64 = vector.shape_cast %63 : vector<1xf32> to vector<1x1x1xf32>
    %65 = vector.extract %64[0, 0, 0] : f32 from vector<1x1x1xf32>
    %66 = vector.broadcast %65 : f32 to vector<1x1x128xf32>
    %67 = arith.addf %60, %66 : vector<1x1x128xf32>
    %c0_34 = arith.constant 0 : index
    %c0_35 = arith.constant 0 : index
    %c0_36 = arith.constant 0 : index
    %68 = vector.load %arg8[%c0_34, %c0_35, %c0_36] : memref<1x1x128xf32, #tpu.memory_space<vmem>>, vector<1x1x128xf32>
    tpu.vector_store %arg8[%c0_34, %c0_35, %c0_36], %67 {strides = array<i32>} : memref<1x1x128xf32, #tpu.memory_space<vmem>>, vector<1x1x128xf32>,
    return
  }
  func.func @transform_0(%arg0: i32, %arg1: i32) -> (i32, i32) {
    %c1_i32 = arith.constant 1 : i32
    %0 = arith.muli %arg0, %c1_i32 : i32
    %1 = arith.addi %0, %arg1 : i32
    %c0_i32 = arith.constant 0 : i32
    %2 = arith.minsi %1, %c0_i32 : i32
    %c0_i32_0 = arith.constant 0 : i32
    %c0_i32_1 = arith.constant 0 : i32
    return %2, %c0_i32_0 : i32, i32
  }
  func.func @transform_1(%arg0: i32, %arg1: i32) -> (i32, i32) {
    %c1_i32 = arith.constant 1 : i32
    %0 = arith.muli %arg0, %c1_i32 : i32
    %1 = arith.addi %0, %arg1 : i32
    %c0_i32 = arith.constant 0 : i32
    %2 = arith.minsi %1, %c0_i32 : i32
    %c0_i32_0 = arith.constant 0 : i32
    %c0_i32_1 = arith.constant 0 : i32
    return %2, %c0_i32_0 : i32, i32
  }
  func.func @transform_2(%arg0: i32, %arg1: i32) -> (i32, i32) {
    %c1_i32 = arith.constant 1 : i32
    %0 = arith.muli %arg0, %c1_i32 : i32
    %1 = arith.addi %0, %arg1 : i32
    %c0_i32 = arith.constant 0 : i32
    %2 = arith.minsi %1, %c0_i32 : i32
    %c0_i32_0 = arith.constant 0 : i32
    %c0_i32_1 = arith.constant 0 : i32
    return %2, %c0_i32_0 : i32, i32
  }
  func.func @transform_3(%arg0: i32, %arg1: i32) -> (i32, i32) {
    %c1_i32 = arith.constant 1 : i32
    %0 = arith.muli %arg0, %c1_i32 : i32
    %1 = arith.addi %0, %arg1 : i32
    %c0_i32 = arith.constant 0 : i32
    %2 = arith.minsi %1, %c0_i32 : i32
    %c0_i32_0 = arith.constant 0 : i32
    %c0_i32_1 = arith.constant 0 : i32
    return %2, %c0_i32_0 : i32, i32
  }
  func.func @transform_4(%arg0: i32, %arg1: i32) -> (i32, i32, i32) {
    %c0_i32 = arith.constant 0 : i32
    %c0_i32_0 = arith.constant 0 : i32
    %c0_i32_1 = arith.constant 0 : i32
    return %arg0, %c0_i32, %c0_i32_0 : i32, i32, i32
  }
  func.func @transform_5(%arg0: i32, %arg1: i32) -> (i32, i32, i32) {
    %c0_i32 = arith.constant 0 : i32
    %c0_i32_0 = arith.constant 0 : i32
    %c0_i32_1 = arith.constant 0 : i32
    return %arg0, %c0_i32, %c0_i32_0 : i32, i32, i32
  }
  func.func @transform_6(%arg0: i32, %arg1: i32) -> (i32, i32, i32) {
    %c0_i32 = arith.constant 0 : i32
    %c0_i32_0 = arith.constant 0 : i32
    %c0_i32_1 = arith.constant 0 : i32
    return %arg0, %c0_i32, %c0_i32_0 : i32, i32, i32
  }
}

</mosaic_0001>

<bundles_post_ra>
// kernel: tpu_custom_call.1
= control target key start
LH: loop header
LB: loop body
LE: loop exit
PB: predicated region body
PF: predicated region fallthrough
CT: control target
= control target key end

     0   :  { %12 = vsyncpa [#allocation3], 0  ;;  %s459_s0 = inlined_call_operand.vmem [shape: f32[8,128], index: 0, kind: input, shape index: {}]   ;;  %s460_s1 = inlined_call_operand.vmem [shape: s32[8,1], index: 1, kind: input, shape index: {}]   ;;  %s461_s2 = inlined_call_operand.hbm [shape: f32[8,32], index: 2, kind: input, shape index: {}]   ;;  %s462_s3 = inlined_call_operand.hbm [shape: f32[8,32], index: 3, kind: input, shape index: {}]   ;;  %s463_s4 = inlined_call_operand.hbm [shape: f32[1,1,128], index: 4, kind: output, shape index: {0}]   ;;  %s464_s5 = inlined_call_operand.hbm [shape: f32[1,1,128], index: 5, kind: output, shape index: {1}]   ;;  %s465_s6 = inlined_call_operand.hbm [shape: f32[1,1,128], index: 6, kind: output, shape index: {2}]  }
   0x1   :  { %13 = vsyncpa [#allocation6], 0 }
   0x2   :  { %14 = vsyncpa [#allocation4], 0 }
   0x3   :  { %15 = vsyncpa [#allocation9], 0  ;;  %s388_s21 = smov [#allocation2]   ;;  %s389_s23 = smov [#allocation5]  }
   0x4   :  { %s51_s22 = sshll.u32 %s388_s21, 4  ;;  %s66_s24 = sshll.u32 %s389_s23, 4  ;;  %s52_s22 = int_to_ptr.vmem [resolvable:$true] %s51_s22  ;;  %s67_s24 = int_to_ptr.vmem [resolvable:$true] %s66_s24 }
   0x5   :  { %s288_s25 = scalar_lea.vmem %s52_s22, 128  ;;  %p293_p1 = scmp.lt.s32.totalorder %s52_s22, %s52_s22 }
   0x6   :  { %p289_p0 = scmp.ne.s32.totalorder %s52_s22, %s288_s25  ;;  %p294_p2 = scmp.lt.s32.totalorder %s288_s25, %s288_s25 }
   0x8   :  { %p295_p3 = por %p294_p2, %p293_p1 }
   0xa   :  { %p296_p4 = pnand %p295_p3, %p289_p0 }
   0xc   :  { %299 = shalt.err (!%p296_p4)
}
   0xd   :  { %54 = dma.hbm_to_vmem [thread:$0]  %s461_s2, 128, %s52_s22, [#allocation3]  }
   0xe   :  { %s308_s28 = scalar_lea.vmem %s67_s24, 128  ;;  %p313_p6 = scmp.lt.s32.totalorder %s67_s24, %s67_s24 }
   0xf   :  { %p309_p5 = scmp.ne.s32.totalorder %s67_s24, %s308_s28  ;;  %p314_p7 = scmp.lt.s32.totalorder %s308_s28, %s308_s28 }
  0x11   :  { %p315_p8 = por %p314_p7, %p313_p6 }
  0x13   :  { %p316_p9 = pnand %p315_p8, %p309_p5 }
  0x15   :  { %319 = shalt.err (!%p316_p9)
}
  0x16   :  { %69 = dma.hbm_to_vmem [thread:$0]  %s462_s3, 128, %s67_s24, [#allocation6]  }
  0x17   :  { %380 = dma.done.wait [#allocation3], 128  }
  0x18   :  { %381 = vsyncadd [#allocation3], 4294967168 }
  0x19   :  { %382 = dma.done.wait [#allocation6], 128  }
  0x1a   :  { %383 = vsyncadd [#allocation6], 4294967168  ;;  %v390_v0 = vmov 0   ;;  %v130_v1 = vld [vmem:[%s460_s1] sm:$0xff]  ;;  %v147_v2 = vld [vmem:[#allocation5] sm:$0xff]  ;;  %vm155_vm0 = vcmask 261120   ;;  %v131_v11 = vlaneseq }
  0x1b   :  { %277 = vset.pattern.permute.xlu0 %v390_v0  ;;  %v149_v3 = vmul.f32 1.442695, %v147_v2  ;;  %v145_v4 = vld [vmem:[#allocation2] sm:$0xff]  ;;  %vm161_vm2 = vcmask 7168   ;;  %v391_v24 = vmov 0.0   ;;  %s393_s10 = smov [#allocation8]  }
  0x1c   :  { %134 = vperm.xlu0 %277, %v130_v1   ;;  %v151_v5 = vmul.f32 %v145_v4, %v145_v4  ;;  %v132_v12 = vand.u32 127, %v131_v11  ;;  %v140_v13 = vld [vmem:[%s459_s0] sm:$0xff]  ;;  %121 = vst [vmem:[#allocation7] sm:$0x1] %v391_v24  ;;  %122 = vst [vmem:[#allocation8] sm:$0x1] %v391_v24 }
  0x1d   :  { %278 = vpow2.f32 %v149_v3  ;;  %123 = vst [vmem:[#allocation10] sm:$0x1] %v391_v24  ;;  %s392_s0 = smov [#allocation7]   ;;  %s220_s11 = sshll.u32 %s393_s10, 4  ;;  %s221_s11 = int_to_ptr.vmem [resolvable:$true] %s220_s11 }
  0x1e   :  { %s210_s1 = sshll.u32 %s392_s0, 4  ;;  %s394_s13 = smov [#allocation10]   ;;  %s211_s1 = int_to_ptr.vmem [resolvable:$true] %s210_s1 }
  0x1f   :  { %s230_s14 = sshll.u32 %s394_s13, 4  ;;  %s320_s16 = scalar_lea.vmem %s211_s1, 16  ;;  %s442_s14 = int_to_ptr.vmem [resolvable:$true] %s230_s14 }
  0x20   :  { %p321_p10 = scmp.ne.s32.totalorder %s211_s1, %s320_s16  ;;  %s324_s17 = scalar_lea.vmem %s211_s1, 32 }
  0x21   :  { %p325_p11 = scmp.lt.s32.totalorder %s211_s1, %s211_s1  ;;  %p326_p12 = scmp.lt.s32.totalorder %s324_s17, %s320_s16 }
  0x23   :  { %v160_v46 = vld [vmem:[#allocation7] sm:$0x1]  ;;  %v175_v47 = vld [vmem:[#allocation8] sm:$0x1]  ;;  %p327_p13 = por %p326_p12, %p325_p11 }
  0x24   :  { %v189_v52 = vld [vmem:[#allocation10] sm:$0x1] }
  0x25   :  { %p328_p0 = pnand %p327_p13, %p321_p10 }
  0x2a   :  { %v279_v6 = vpop.eup %278 }
  0x2b   :  { %v152_v7 = vadd.f32 %v279_v6, %v151_v5 }
  0x2d   :  { %v263_v8 = vadd.f32 -1.0, %v152_v7 }
  0x2f   :  { %v154_v9 = vsub.f32 %v263_v8, %v147_v2 }
  0x31   :  { %v156_v10 = vsel %vm155_vm0, %v154_v9, 0.0 }
  0x3b   :  { %157 = vadd.xlane.f32.xlu0 %v156_v10 }
  0x97   :  { %v135_v14 = vpop.permute.xlu0 %134 }
  0x98   :  { %vm136_vm1 = vcmp.eq.s32.totalorder %v132_v12, %v135_v14 }
  0x99   :  { %v141_v15 = vsel %vm136_vm1, %v140_v13, 0.0 }
  0x9a   :  { %142 = vadd.xlane.f32.xlu1 %v141_v15 }
  0xc4   :  { %v158_v16 = vpop.xlane.xlu0 %157 }
  0xc5   :  { %v159_v17 = vmul.f32 0.03125, %v158_v16 }
  0xc7   :  { %v176_v18 = vsel %vm161_vm2, %v159_v17, 0.0  ;;  %v190_v21 = vmul.f32 %v159_v17, %v159_v17 }
  0xc8   :  { %177 = vadd.xlane.f32.xlu1 %v176_v18 }
  0xc9   :  { %v191_v23 = vsel %vm161_vm2, %v190_v21, 0.0 }
 0x123   :  { %v143_v19 = vpop.xlane.xlu1 %142 }
 0x124   :  { %v144_v20 = vsub.f32 0.0, %v143_v19 }
 0x126   :  { %v162_v22 = vsel %vm161_vm2, %v144_v20, 0.0 }
 0x127   :  { %163 = vadd.xlane.f32.xlu1 %v162_v22 }
 0x12b   :  { %192 = vadd.xlane.f32.xlu1 %v191_v23 }
 0x151   :  { %v178_v25 = vpop.xlane.xlu1 %177 }
 0x152   :  { %v179_v26 = vrot.slane %v178_v25, 4 }
 0x154   :  { %v180_v27 = vadd.f32 %v179_v26, %v178_v25 }
 0x156   :  { %v181_v28 = vrot.slane %v180_v27, 2 }
 0x158   :  { %v182_v33 = vadd.f32 %v181_v28, %v180_v27 }
 0x15a   :  { %v183_v38 = vrot.slane %v182_v33, 1 }
 0x15c   :  { %v184_v43 = vadd.f32 %v183_v38, %v182_v33 }
 0x1b0   :  { %v164_v29 = vpop.xlane.xlu1 %163 }
 0x1b1   :  { %v165_v30 = vrot.slane %v164_v29, 4 }
 0x1b3   :  { %v166_v31 = vadd.f32 %v165_v30, %v164_v29 }
 0x1b4   :  { %v193_v32 = vpop.xlane.xlu1 %192 }
 0x1b5   :  { %v167_v34 = vrot.slane %v166_v31, 2  ;;  %v194_v35 = vrot.slane %v193_v32, 4 }
 0x1b7   :  { %v195_v36 = vadd.f32 %v194_v35, %v193_v32  ;;  %v168_v37 = vadd.f32 %v167_v34, %v166_v31 }
 0x1b9   :  { %v196_v39 = vrot.slane %v195_v36, 2  ;;  %v169_v40 = vrot.slane %v168_v37, 1 }
 0x1bb   :  { %v197_v41 = vadd.f32 %v196_v39, %v195_v36  ;;  %v170_v42 = vadd.f32 %v169_v40, %v168_v37 }
 0x1bd   :  { %264 = vpush %v170_v42  ;;  %v198_v44 = vrot.slane %v197_v41, 1 }
 0x1be   :  { %266 = vpush %v184_v43 }
 0x1bf   :  { %v199_v45 = vadd.f32 %v198_v44, %v197_v41 }
 0x1c1   :  { %268 = vpush %v199_v45 }
 0x1ee   :  { %s265_s9 = spop %264 }
 0x1ef   :  { %v172_v48 = vstv %s265_s9  ;;  %s267_s12 = spop %266 }
 0x1f0   :  { %v173_v49 = vadd.f32 %v172_v48, %v160_v46  ;;  %v186_v50 = vstv %s267_s12 }
 0x1f1   :  { %v187_v51 = vadd.f32 %v186_v50, %v175_v47 }
 0x1f2   :  { %174 = vst [vmem:[#allocation7] sm:$0x1] %v173_v49  ;;  %s269_s15 = spop %268 }
 0x1f3   :  { %188 = vst [vmem:[#allocation8] sm:$0x1] %v187_v51  ;;  %v201_v53 = vstv %s269_s15 }
 0x1f4   :  { %331 = shalt.err (!%p328_p0)
}
 0x1f5   :  { %213 = dma.vmem_to_hbm [thread:$0]  %s211_s1, 16, %s463_s4, [#allocation4]   ;;  %v202_v54 = vadd.f32 %v201_v53, %v189_v52 }
 0x1f6   :  { %s340_s20 = scalar_lea.vmem %s221_s11, 16  ;;  %s344_s21 = scalar_lea.vmem %s221_s11, 32 }
 0x1f7   :  { %p341_p1 = scmp.ne.s32.totalorder %s221_s11, %s340_s20  ;;  %p345_p2 = scmp.lt.s32.totalorder %s221_s11, %s221_s11 }
 0x1f8   :  { %p346_p3 = scmp.lt.s32.totalorder %s344_s21, %s340_s20 }
 0x1fa   :  { %p347_p4 = por %p346_p3, %p345_p2 }
 0x1fc   :  { %p348_p5 = pnand %p347_p4, %p341_p1 }
 0x1fe   :  { %351 = shalt.err (!%p348_p5)
}
 0x1ff   :  { %223 = dma.vmem_to_hbm [thread:$0]  %s221_s11, 16, %s464_s5, [#allocation9]   ;;  %203 = vst [vmem:[#allocation10] sm:$0x1] %v202_v54 }
 0x200   :  { %s360_s24 = scalar_lea.vmem %s442_s14, 16  ;;  %s364_s4 = scalar_lea.vmem %s442_s14, 32 }
 0x201   :  { %p361_p6 = scmp.ne.s32.totalorder %s442_s14, %s360_s24  ;;  %p365_p7 = scmp.lt.s32.totalorder %s442_s14, %s442_s14 }
 0x202   :  { %p366_p8 = scmp.lt.s32.totalorder %s364_s4, %s360_s24 }
 0x204   :  { %p367_p9 = por %p366_p8, %p365_p7 }
 0x206   :  { %p368_p10 = pnand %p367_p9, %p361_p6 }
 0x208   :  { %371 = shalt.err (!%p368_p10)
}
 0x209   :  { %233 = dma.vmem_to_hbm [thread:$0]  %s442_s14, 16, %s465_s6, [#allocation9]  }
 0x20a   :  { %384 = dma.done.wait [#allocation4], 16  }
 0x20b   :  { %385 = vsyncadd [#allocation4], 4294967280 }
 0x20c   :  { %386 = dma.done.wait [#allocation9], 32  }
 0x20d   :  { %387 = vsyncadd [#allocation9], 4294967264 }
 0x20e   :  { %243 = vsyncpa [#allocation3], 1 }
 0x20f   :  { %244 = vsyncpa [#allocation6], 1 }
 0x210   :  { %245 = vsyncpa [#allocation4], 1 }
 0x211   :  { %246 = vsyncpa [#allocation9], 1 }

</bundles_post_ra>
